<compile_context>
chip_gen: v7x
topology: tpu7x:2x2x1
jax: 0.10.0
libtpu: 0.0.40
codegen_flags: <defaults>
</compile_context>

<pallas_src>
import jax
import jax.numpy as jnp
from jax.experimental import pallas as pl
from jax.experimental.pallas import tpu as pltpu


# ----------------------------------------------------------------------------
# Kernel body
# ----------------------------------------------------------------------------
def _pointwise_conv_kernel(x_ref, w_ref, b_ref, o_ref):
    # x_ref: (C_in, TILE_S)   w_ref: (TILE_CO, C_in)   b_ref: (TILE_CO, 1) f32
    # o_ref: (TILE_CO, TILE_S)
    y = jnp.dot(w_ref[...], x_ref[...], preferred_element_type=jnp.float32)
    o_ref[...] = (y + b_ref[...]).astype(o_ref.dtype)


# ----------------------------------------------------------------------------
# Tiling policy (generation-aware, VMEM-budgeted)
# ----------------------------------------------------------------------------
def _round_down(x, m):
    return (x // m) * m


def _round_up(x, m):
    return ((x + m - 1) // m) * m


def _vmem_capacity_bytes():
    """Physical VMEM per TensorCore; conservative fallback = v7x (64 MiB)."""
    try:
        info = pltpu.get_tpu_info()
        cap = getattr(info, "vmem_capacity_bytes", None)
        if cap:
            return int(cap)
    except Exception:
        pass
    return 64 * 1024 * 1024


def _choose_tiles(N, S, c_in, c_out, itemsize):
    """Returns (tile_s, tile_co, s_tiles, co_tiles, vmem_limit_bytes)."""
    capacity = _vmem_capacity_bytes()
    budget = capacity // 2                         # keep ample pipelining headroom

    # --- C_out tiling: only when the resident weight would be large --------
    w_bytes = c_out * c_in * itemsize
    tile_co = c_out
    if w_bytes > 8 * 1024 * 1024 and c_out > 8:
        # target a <= ~4 MiB weight tile; tile_co must be 8-aligned (sublanes)
        target_rows = max(8, (4 * 1024 * 1024) // max(c_in * itemsize, 1))
        tile_co = max(8, _round_down(min(target_rows, c_out), 8))
        if tile_co >= c_out:
            tile_co = c_out
    co_tiles = pl.cdiv(c_out, tile_co)

    # Resident weight + bias buffers (Pallas double-buffers every input spec).
    resident_bytes = 2 * (tile_co * c_in + tile_co) * itemsize

    # --- spatial tile: fill the remaining budget (no artificial 8K cap) ----
    tile_budget = max(budget - resident_bytes, 256 * 1024)
    per_lane = 2 * (c_in + tile_co) * itemsize     # double-buffered in + out
    cap_lanes = tile_budget // max(per_lane, 1)
    cap_lanes = max(128, min(cap_lanes, 65536))    # sanity cap only
    if S <= cap_lanes:
        tile_s = S                                 # full extent: always layout-legal
    else:
        tile_s = _round_down(cap_lanes, 128)       # 128-aligned; edge block masked

    # --- guarantee >= 2 grid steps so v7x megacore can shard ----------------
    if N == 1 and co_tiles == 1 and tile_s >= S and S > 128:
        tile_s = min(S, _round_up(pl.cdiv(S, 2), 128))

    s_tiles = pl.cdiv(S, tile_s)

    # --- VMEM limit from the real working set (clamped to physical) --------
    x_block = c_in * tile_s * itemsize
    out_block = tile_co * tile_s * itemsize
    bufs = 3 if (x_block < (1 << 20) and s_tiles >= 3) else 2   # deeper x pipeline
    working_set = bufs * x_block + 2 * out_block + resident_bytes
    vmem_limit = int(min(max(2 * working_set + (2 << 20), 32 << 20),
                         int(capacity * 0.9)))

    return tile_s, tile_co, s_tiles, co_tiles, bufs, vmem_limit


# ----------------------------------------------------------------------------
# Wrapper
# ----------------------------------------------------------------------------
def pointwise_conv3d(x_ncdhw, weight, bias, compute_dtype=None):
    """1x1x1 Conv3d.

    x_ncdhw : (N, C_in, D, H, W)
    weight  : (C_out, C_in, 1, 1, 1)
    bias    : (C_out,)
    compute_dtype: optional streaming dtype (e.g. jnp.bfloat16) for a
      bandwidth-halving path; accumulation / bias stay f32. Note: weights are
      quantized to this dtype too (slightly different from f32-weight PyTorch).
    """
    N, C_in, D, H, W = x_ncdhw.shape
    C_out = weight.shape[0]
    S = D * H * W

    stream_dtype = compute_dtype if compute_dtype is not None else x_ncdhw.dtype

    # Free, contiguous reshape: channels-first, spatial flattened onto lanes.
    x3 = x_ncdhw.reshape(N, C_in, S).astype(stream_dtype)
    w2d = weight.reshape(C_out, C_in).astype(stream_dtype)     # (C_out, C_in)
    b2d = bias.reshape(C_out, 1).astype(jnp.float32)           # (C_out, 1) f32

    itemsize = jnp.dtype(stream_dtype).itemsize
    tile_s, tile_co, s_tiles, co_tiles, bufs, vmem_limit = _choose_tiles(
        N, S, C_in, C_out, itemsize)

    # x block spec (batch dim squeezed); optionally 3-deep buffered when small.
    x_map = lambda n, co, s: (n, 0, s)
    x_spec = pl.BlockSpec((None, C_in, tile_s), x_map)
    if bufs == 3:
        try:
            x_spec = pl.BlockSpec((None, C_in, tile_s), x_map,
                                  pipeline_mode=pl.Buffered(3))
        except TypeError:
            pass  # older API: fall back to default double buffering

    cost = pl.CostEstimate(
        flops=2 * N * S * C_in * C_out,
        transcendentals=0,
        bytes_accessed=(N * S * C_in * co_tiles      # x re-read per C_out tile
                        + N * S * C_out              # output written once
                        + C_out * C_in + C_out) * itemsize,
    )

    out3 = pl.pallas_call(
        _pointwise_conv_kernel,
        out_shape=jax.ShapeDtypeStruct((N, C_out, S), stream_dtype),
        grid_spec=pltpu.PrefetchScalarGridSpec(
            num_scalar_prefetch=0,
            grid=(N, co_tiles, s_tiles),
            in_specs=[
                x_spec,
                pl.BlockSpec((tile_co, C_in), lambda n, co, s: (co, 0)),  # resident per co
                pl.BlockSpec((tile_co, 1), lambda n, co, s: (co, 0)),     # resident per co
            ],
            out_specs=pl.BlockSpec((None, tile_co, tile_s),
                                   lambda n, co, s: (n, co, s)),
        ),
        compiler_params=pltpu.CompilerParams(
            dimension_semantics=("parallel", "parallel", "parallel"),
            vmem_limit_bytes=vmem_limit,
        ),
        cost_estimate=cost,
    )(x3, w2d, b2d)

    return out3.reshape(N, C_out, D, H, W)         # free reshape back


# ----------------------------------------------------------------------------
# Module port
# ----------------------------------------------------------------------------
class ResBlock3D:
    """JAX/Pallas port of the PyTorch ResBlock3D. forward(x) = conv(x).

    The transconv parameters exist for __init__ parity but are never used in
    forward (matching the PyTorch module).
    """

    def __init__(self, in_chan, out_chan, key):
        self.in_chan = in_chan
        self.out_chan = out_chan
        k1, k2, k3, k4 = jax.random.split(key, 4)
        fan_in = in_chan  # kernel_size=1 -> fan_in = in_chan
        bound = 1.0 / (fan_in ** 0.5)
        self.conv_weight = jax.random.uniform(
            k1, (out_chan, in_chan, 1, 1, 1), jnp.float32, -bound, bound)
        self.conv_bias = jax.random.uniform(
            k2, (out_chan,), jnp.float32, -bound, bound)
        # transconv params (unused in forward)
        # TODO(synk): transconv is defined but never applied in the reference forward.
        self.transconv_weight = jax.random.uniform(
            k3, (in_chan, out_chan, 1, 1, 1), jnp.float32, -bound, bound)
        self.transconv_bias = jax.random.uniform(
            k4, (out_chan,), jnp.float32, -bound, bound)

    def __call__(self, x):
        return pointwise_conv3d(x, self.conv_weight, self.conv_bias)


if __name__ == "__main__":
    key = jax.random.PRNGKey(0)
    k_param, k_x = jax.random.split(key)

    N, C_in, C_out = 2, 4, 8
    D = H = W = 8
    x = jax.random.normal(k_x, (N, C_in, D, H, W), jnp.float32)

    block = ResBlock3D(C_in, C_out, k_param)
    y = block(x)
    y = jax.block_until_ready(y)

    # Reference check in plain JAX (same math: per-voxel matmul + bias).
    w2d = block.conv_weight.reshape(C_out, C_in)
    ref = jnp.einsum("ncdhw,oc->nodhw", x, w2d) \
        + block.conv_bias[None, :, None, None, None]
    assert y.shape == (N, C_out, D, H, W)
    assert jnp.allclose(y, ref, atol=1e-5, rtol=1e-5)

    print("KERNEL_OK")
</pallas_src>

<mosaic_0001>
module attributes {stable_mosaic.version = 11 : i64} {
  func.func @_pointwise_conv_kernel(%arg0: i32, %arg1: i32, %arg2: i32, %arg3: memref<1x4x512xf32, #tpu.memory_space<vmem>>, %arg4: memref<8x4xf32, #tpu.memory_space<vmem>>, %arg5: memref<8x1xf32, #tpu.memory_space<vmem>>, %arg6: memref<1x8x512xf32, #tpu.memory_space<vmem>>) attributes {dimension_semantics = [#tpu.dimension_semantics<parallel>, #tpu.dimension_semantics<parallel>, #tpu.dimension_semantics<parallel>], iteration_bounds = array<i64: 2, 1, 1>, scalar_prefetch = 0 : i64, scratch_operands = 0 : i64, tpu.core_type = #tpu.core_type<tc>, window_params = [{transform_indices = @transform_0, window_bounds = array<i64: 1, 4, 512>}, {transform_indices = @transform_1, window_bounds = array<i64: 8, 4>}, {transform_indices = @transform_2, window_bounds = array<i64: 8, 1>}, {transform_indices = @transform_3, window_bounds = array<i64: 1, 8, 512>}]} {
    %c0 = arith.constant 0 : index
    %c0_0 = arith.constant 0 : index
    %0 = vector.load %arg4[%c0, %c0_0] : memref<8x4xf32, #tpu.memory_space<vmem>>, vector<8x4xf32>
    %c0_1 = arith.constant 0 : index
    %c0_2 = arith.constant 0 : index
    %c0_3 = arith.constant 0 : index
    %1 = vector.load %arg3[%c0_1, %c0_2, %c0_3] : memref<1x4x512xf32, #tpu.memory_space<vmem>>, vector<1x4x512xf32>
    %2 = vector.shape_cast %1 : vector<1x4x512xf32> to vector<4x512xf32>
    %cst = arith.constant dense<0.000000e+00> : vector<8x512xf32>
    %3 = tpu.matmul %0, %2, %cst {dimension_numbers = #tpu.dot_dimension_numbers<[1], [0], [0], [1], [0, 0, 1, 1], [], []>} : vector<8x4xf32>, vector<4x512xf32>, vector<8x512xf32> -> vector<8x512xf32>
    %c0_4 = arith.constant 0 : index
    %c0_5 = arith.constant 0 : index
    %4 = vector.load %arg5[%c0_4, %c0_5] : memref<8x1xf32, #tpu.memory_space<vmem>>, vector<8x1xf32>
    %5 = vector.broadcast %4 : vector<8x1xf32> to vector<8x512xf32>
    %6 = arith.addf %3, %5 : vector<8x512xf32>
    %c0_6 = arith.constant 0 : index
    %c0_7 = arith.constant 0 : index
    %c0_8 = arith.constant 0 : index
    %7 = vector.load %arg6[%c0_6, %c0_7, %c0_8] : memref<1x8x512xf32, #tpu.memory_space<vmem>>, vector<1x8x512xf32>
    %8 = vector.shape_cast %7 : vector<1x8x512xf32> to vector<8x512xf32>
    %9 = vector.shape_cast %6 : vector<8x512xf32> to vector<1x8x512xf32>
    tpu.vector_store %arg6[%c0_6, %c0_7, %c0_8], %9 {strides = array<i32>} : memref<1x8x512xf32, #tpu.memory_space<vmem>>, vector<1x8x512xf32>,
    return
  }
  func.func @transform_0(%arg0: i32, %arg1: i32, %arg2: i32) -> (i32, i32, i32) {
    %c0_i32 = arith.constant 0 : i32
    %c0_i32_0 = arith.constant 0 : i32
    return %arg0, %c0_i32, %arg2 : i32, i32, i32
  }
  func.func @transform_1(%arg0: i32, %arg1: i32, %arg2: i32) -> (i32, i32) {
    %c0_i32 = arith.constant 0 : i32
    %c0_i32_0 = arith.constant 0 : i32
    return %arg1, %c0_i32 : i32, i32
  }
  func.func @transform_2(%arg0: i32, %arg1: i32, %arg2: i32) -> (i32, i32) {
    %c0_i32 = arith.constant 0 : i32
    %c0_i32_0 = arith.constant 0 : i32
    return %arg1, %c0_i32 : i32, i32
  }
  func.func @transform_3(%arg0: i32, %arg1: i32, %arg2: i32) -> (i32, i32, i32) {
    %c0_i32 = arith.constant 0 : i32
    return %arg0, %arg1, %arg2 : i32, i32, i32
  }
}

</mosaic_0001>

<bundles_post_ra>
// kernel: tpu_custom_call.1
= control target key start
LH: loop header
LB: loop body
LE: loop exit
PB: predicated region body
PF: predicated region fallthrough
CT: control target
= control target key end

     0   :  { %8 = vsyncpa [#allocation3], 0  ;;  %s969_s0 = inlined_call_operand.hbm [shape: f32[2,4,512], index: 0, kind: input, shape index: {}]   ;;  %s970_s1 = inlined_call_operand.vmem [shape: f32[8,4], index: 1, kind: input, shape index: {}]   ;;  %s971_s2 = inlined_call_operand.vmem [shape: f32[8,1], index: 2, kind: input, shape index: {}]   ;;  %s972_s3 = inlined_call_operand.hbm [shape: f32[2,8,512], index: 3, kind: output, shape index: {}]  }
   0x1   :  { %10 = vsyncpa [#allocation3 + $0x1], 0 }
   0x2   :  { %11 = vsyncpa [#allocation4], 0 }
   0x3   :  { %13 = vsyncpa [#allocation4 + $0x1], 0  ;;  %s790_s12 = smov 0   ;;  %s792_s13 = smov 0  }
   0x4   :  { %s794_s14 = smov 0   ;;  %s796_s15 = smov 0  }
   0x5   :  { %s798_s16 = smov 0   ;;  %s800_s17 = smov 0  }
   0x6 LB: > { %s560_s18 = sadd.s32 4294967295, %s764_s17   ;;  %s561_s19 = sadd.s32 4294967294, %s764_s17   ;;  %s764_s17 = sphi %s800_s17, %s19_s17   ;;  %s760_s16 = sphi %s798_s16, %s988_s16   ;;  %s756_s15 = sphi %s796_s15, %s987_s15   ;;  %s752_s14 = sphi %s794_s14, %s986_s14   ;;  %s748_s13 = sphi %s792_s13, %s985_s13   ;;  %s744_s12 = sphi %s790_s12, %s984_s12  }
   0x7   : > { %s38_s20 = sadd.s32 1, %s760_s16  ;;  %s47_s21 = sadd.s32 1, %s752_s14 }
   0x8   : > { %p40_p0 = scmp.ge.s32.totalorder %s38_s20, 2  ;;  %p54_p1 = scmp.ne.s32.totalorder %s752_s14, %s748_s13 }
   0x9   : > { %p55_p2 = scmp.eq.s32.totalorder %s764_s17, 0  ;;  %p60_p3 = scmp.ne.s32.totalorder %s748_s13, %s744_s12 }
   0xa   : > { %s990_s20 = smov (%p40_p0, %s38_s20), 0  ;;  %p61_p5 = scmp.eq.s32.totalorder %s560_s18, 0 }
   0xb   : > { %p831_p4 = por %p55_p2, %p54_p1  ;;  %s42_s23 = ssub.s32 %s760_s16, %s990_s20 }
   0xc   : > { %p140_p6 = scmp.eq.s32.totalorder %s560_s18, 1  ;;  %p45_p7 = scmp.eq.s32.totalorder %s42_s23, 0 }
   0xd   : > { %p837_p8 = por %p61_p5, %p60_p3  ;;  %p146_p10 = scmp.eq.s32.totalorder %s561_s19, 1 }
   0xe   : > { %p841_p9 = por %p140_p6, %p54_p1  ;;  %p597_p13 = scmp.lt.s32.totalorder %s764_s17, 2 }
   0xf   : > { %s846_s26 = scalar_select %p45_p7, %s752_s14, %s47_s21  }
  0x10   : > { %s976_s25 = scalar_select %p841_p9, 1, 0 }
  0x11   : > { %p848_p11 = por %p146_p10, %p60_p3  ;;  %s180_s28 = sand.u32 1, %s752_s14  }
  0x12   : > { %s566_s29 = sshll.u32 %s180_s28, 4  ;;  %s583_s30 = sshll.u32 %s760_s16, 8 }
  0x13   : > { %s977_s27 = scalar_select %p848_p11, 1, 0 }
  0x14   : > { %s859_s6 = scalar_lea.hbm %s969_s0, %s583_s30  ;;  %s184_s7 = scalar_lea.vmem [#allocation2], %s566_s29 }
  0x15   : > { %s194_s8 = sshll.u32 %s184_s7, 4  ;;  %p865_p0 = pnand %p597_p13, %p831_p4  ;;  %s861_s8 = int_to_ptr.vmem [resolvable:$true] %s194_s8 }
  0x16   : > { %s181_s10 = scalar_lea.sflag [#allocation3], %s180_s28  ;;  %s652_s11 = scalar_lea.hbm %s859_s6, 256 }
  0x17   : > { %p653_p3 = scmp.ne.s32.totalorder %s859_s6, %s652_s11  ;;  %p654_p5 = pneg %p865_p0 }
  0x18   : > { %s657_s21 = scalar_lea.hbm %s969_s0, 512  ;;  %p658_p4 = scmp.lt.u32.totalorder %s859_s6, %s969_s0 }
  0x19   : > { %p655_p6 = pnand %p654_p5, %p653_p3  ;;  %p659_p10 = scmp.lt.u32.totalorder %s657_s21, %s652_s11 }
  0x1a   : > { %p661_p12 = scmp.lt.u32.totalorder %s652_s11, %s859_s6 }
  0x1b   : > { %p656_p7 = pneg %p655_p6  ;;  %p660_p13 = por %p659_p10, %p658_p4 }
  0x1d   : > { %p662_p1 = por %p661_p12, %p660_p13 }
  0x1f   : > { %p663_p2 = pnand %p662_p1, %p656_p7 }
  0x21   : > { %666 = shalt.err (!%p663_p2)
}
  0x22   : > { %s667_s28 = scalar_lea.vmem %s861_s8, 256  ;;  %s766_s29 = smov [#allocation2]  }
  0x23   : > { %p668_p3 = scmp.ne.s32.totalorder %s861_s8, %s667_s28  ;;  %s672_s30 = sshll.u32 %s766_s29, 4  ;;  %s673_s30 = int_to_ptr.vmem [resolvable:$false] %s672_s30 }
  0x24   : > { %s674_s4 = scalar_lea.vmem %s673_s30, 512  ;;  %p675_p9 = scmp.lt.s32.totalorder %s861_s8, %s673_s30 }
  0x25   : > { %p670_p6 = pnand %p668_p3, %p654_p5  ;;  %p676_p4 = scmp.lt.s32.totalorder %s674_s4, %s667_s28 }
  0x27   : > { %p671_p11 = pneg %p670_p6  ;;  %p677_p10 = por %p676_p4, %p675_p9 }
  0x29   : > { %p678_p12 = pnand %p677_p10, %p671_p11 }
  0x2b   : > { %681 = shalt.err (!%p678_p12)
}
  0x2c   : > { %592 = dma.hbm_to_vmem [thread:$0]  (!%p865_p0), %s859_s6, 256, %s861_s8, %s181_s10  }
  0x2d   : > { %p979_p1 = scmp.lt.s32.totalorder %s764_s17, 3  ;;  %p980_p2 = scmp.ge.s32.totalorder %s764_s17, 1 }
  0x2f   : > { %p200_p5 = pnand %p980_p2, %p979_p1 }
  0x30   : > { %s901_s5 = sand.u32 (!%p200_p5), 1, %s748_s13  }
  0x31   : > { %203 = sbr.rel (%p200_p5) target bundleno = 292 (0x124), region = 32  ;;  %s570_s7 = sshll.u32 (!%p200_p5), %s901_s5, 4 }
  0x32   : > { %s206_s11 = scalar_lea.sflag (!%p200_p5), [#allocation3], %s901_s5  ;;  %s209_s18 = scalar_lea.vmem (!%p200_p5), [#allocation2], %s570_s7 }
  0x38   : > { %735 = dma.done.wait (%p837_p8), %s206_s11, 256  }
  0x39   : > { %737 = vsyncadd (%p837_p8), %s206_s11, 4294967040  ;;  %v767_v0 = vmov 0.0   ;;  %v768_v1 = vmov 0   ;;  %v251_v2 = vld [vmem:[%s209_s18] sm:$0xff]  ;;  %vm267_vm0 = vcmask 1043456   ;;  %v252_v3 = vld [vmem:[%s209_s18 + $0x8] sm:$0xff] }
  0x3a   : > { %340 = vmatprep.mubr.f32.mxu0 %v767_v0  ;;  %411 = vmatprep.mubr.f32.mxu1 %v767_v0  ;;  %v261_v4 = vcombine.high %v251_v2, %v251_v2  ;;  %v262_v5 = vcombine.high %v252_v3, %v252_v3  ;;  %v253_v6 = vld [vmem:[%s971_s2] sm:$0xff]  ;;  %vm263_vm1 = vcmask 31744   ;;  %s571_s24 = sshll.u32 %s901_s5, 5  ;;  %s584_s19 = sshll.u32 %s756_s15, 9 }
  0x3b   : > { %649 = vset.pattern.permute.xlu0 %v768_v1  ;;  %v250_v7 = vld [vmem:[%s970_s1] sm:$0xff]  ;;  %s239_s21 = scalar_lea.vmem [#allocation5], %s571_s24  ;;  %s920_s29 = scalar_lea.hbm %s972_s3, %s584_s19 }
  0x3c   : > { %256 = vperm.xlu0 %649, %v253_v6   ;;  %572 = vmatprep.subr.msk.mxu0 %vm267_vm0, %v261_v4  ;;  %s441_s22 = sshll.u32 %s239_s21, 4  ;;  %s423_s15 = scalar_lea.sflag [#allocation4], %s901_s5  ;;  %s922_s22 = int_to_ptr.vmem [resolvable:$true] %s441_s22 }
  0x3d   : > { %575 = vmatprep.subr.msk.mxu1 %vm267_vm0, %v262_v5  ;;  %573 = vmatpush1.msk.msra.mxu0 %vm267_vm0, %v251_v2  ;;  %s682_s30 = scalar_lea.vmem %s922_s22, 512  ;;  %p981_p9 = scmp.ne.s32.totalorder %s976_s25, 0 }
  0x3e   : > { %576 = vmatpush1.msk.msra.mxu1 %vm267_vm0, %v252_v3  ;;  %574 = vmatmul.mubr.msk.f32.vlgmr.msra.gmra.mrb[0].mxu0 %vm263_vm1, %v250_v7  ;;  %p683_p8 = scmp.ne.s32.totalorder %s922_s22, %s682_s30  ;;  %s769_s4 = smov [#allocation5]  }
  0x3f   : > { %577 = vmatmul.mubr.msk.f32.vlgmr.msra.gmra.mrb[0].mxu1 %vm263_vm1, %v250_v7  ;;  %s686_s7 = sshll.u32 %s769_s4, 4  ;;  %s687_s7 = int_to_ptr.vmem [resolvable:$false] %s686_s7 }
  0x40   : > { %p684_p11 = pnand %p683_p8, %p981_p9  ;;  %s688_s11 = scalar_lea.vmem %s687_s7, 1024 }
  0x41   : > { %p689_p7 = scmp.lt.s32.totalorder %s922_s22, %s687_s7  ;;  %p690_p13 = scmp.lt.s32.totalorder %s688_s11, %s682_s30 }
  0x42   : > { %p685_p0 = pneg %p684_p11 }
  0x43   : > { %p691_p3 = por %p690_p13, %p689_p7 }
  0x45   : > { %p692_p6 = pnand %p691_p3, %p685_p0 }
  0xbb   : > { %v257_v8 = vpop.permute.xlu0 %256 }
 0x111   : > { %v342_v9 = vpop.f32.mrb[0].mxu0 }
 0x112   : > { %v413_v10 = vpop.f32.mrb[0].mxu1  ;;  %v343_v11 = vadd.f32 %v342_v9, %v257_v8  ;;  %v344_v13 = vpop.f32.mrb[1].mxu0 }
 0x113   : > { %v414_v12 = vadd.f32 %v413_v10, %v257_v8  ;;  %v415_v14 = vpop.f32.mrb[1].mxu1  ;;  %v345_v15 = vadd.f32 %v344_v13, %v257_v8 }
 0x114   : > { %v416_v16 = vadd.f32 %v415_v14, %v257_v8  ;;  %418 = vst [vmem:[%s239_s21] sm:$0xff] %v343_v11 }
 0x115   : > { %420 = vst [vmem:[%s239_s21 + $0x10] sm:$0xff] %v414_v12  ;;  %419 = vst [vmem:[%s239_s21 + $0x8] sm:$0xff] %v345_v15 }
 0x116   : > { %421 = vst [vmem:[%s239_s21 + $0x18] sm:$0xff] %v416_v16 }
 0x117   : > { %695 = shalt.err (!%p692_p6)
}
 0x118   : > { %s696_s5 = scalar_lea.hbm %s920_s29, 512  ;;  %s700_s8 = scalar_lea.hbm %s972_s3, 1024 }
 0x119   : > { %p697_p4 = scmp.ne.s32.totalorder %s920_s29, %s696_s5  ;;  %p701_p1 = scmp.lt.u32.totalorder %s920_s29, %s972_s3 }
 0x11a   : > { %p702_p2 = scmp.lt.u32.totalorder %s700_s8, %s696_s5  ;;  %p704_p8 = scmp.lt.u32.totalorder %s696_s5, %s920_s29 }
 0x11b   : > { %p698_p10 = pnand %p697_p4, %p981_p9 }
 0x11c   : > { %p703_p5 = por %p702_p2, %p701_p1 }
 0x11d   : > { %p699_p12 = pneg %p698_p10 }
 0x11e   : > { %p705_p11 = por %p704_p8, %p703_p5 }
 0x120   : > { %p706_p0 = pnand %p705_p11, %p699_p12 }
 0x122   : > { %709 = shalt.err (!%p706_p0)
}
 0x123   : > { %587 = dma.vmem_to_hbm [thread:$0]  (%p981_p9), %s922_s22, 512, %s920_s29, %s423_s15  }
 0x124 PF: > { %s453_s24 = sand.u32 1, %s744_s12   ;;  %p982_p7 = scmp.ne.s32.totalorder %s977_s27, 0 }
 0x125   : > { %p983_p13 = scmp.ge.s32.totalorder %s764_s17, 2  ;;  %s454_s19 = scalar_lea.sflag [#allocation4], %s453_s24 }
 0x127   : > { %p594_p3 = pnand %p983_p13, %p982_p7 }
 0x129   : > { %739 = dma.done.wait (!%p594_p3), %s454_s19, 512  }
 0x12a   : > { %741 = vsyncadd (!%p594_p3), %s454_s19, 4294966784  ;;  %s19_s17 = sadd.s32 1, %s764_s17   ;;  %s984_s12 = smov %s748_s13 }
 0x12b   : > { %p16_p6 = scmp.ge.s32.totalorder %s19_s17, 4   ;;  %s985_s13 = smov %s752_s14 }
 0x12c   : > { %s986_s14 = smov %s846_s26  ;;  %s987_s15 = smov %s760_s16 }
 0x12d   : > { %s988_s16 = smov %s990_s20  ;;  %18 = sbr.rel (!%p16_p6) target bundleno = 6 (0x6), region = 83 }
 0x134   :  { %459 = vsyncpa [#allocation3], 1 }
 0x135   :  { %461 = vsyncpa [#allocation3 + $0x1], 1 }
 0x136   :  { %462 = vsyncpa [#allocation4], 1 }
 0x137   :  { %464 = vsyncpa [#allocation4 + $0x1], 1 }

</bundles_post_ra>
